<compile_context>
chip_gen: v7x
topology: tpu7x:2x2x1
jax: 0.10.0
libtpu: 0.0.40
codegen_flags: <defaults>
</compile_context>

<pallas_src>
import jax
import jax.numpy as jnp
from jax import lax
from jax.experimental import pallas as pl
from jax.experimental.pallas import tpu as pltpu

# ----------------------------- configuration ------------------------------
INPUT_DIM = 32
HIDDEN_DIM = 16
CODEBOOK_SIZE = 64
NUM_CODEBOOKS = 3

BATCH_TILE = 32                                   # rows per grid step (mult of 8)
K_PAD = ((CODEBOOK_SIZE + 127) // 128) * 128      # lane-padded codebook axis
LANES = 128


def _align8(n):
    return (n + 7) // 8 * 8


# ---- parameter-slab row offsets (all sublane-aligned) ----
_R_W1 = 0                                         # [INPUT_DIM, 2H]
_R_W2 = _align8(_R_W1 + INPUT_DIM)                # [2H, H]
_R_W3 = _align8(_R_W2 + 2 * HIDDEN_DIM)           # [H, 2H]
_R_W4 = _align8(_R_W3 + HIDDEN_DIM)               # [2H, INPUT_DIM]
_R_B = _align8(_R_W4 + 2 * HIDDEN_DIM)            # 4 bias rows (8 reserved)
_R_CBT = _R_B + 8                                 # fused dist mats, per level
_CBT_ROWS = _align8(HIDDEN_DIM + 1)               # H rows of -2*C^T + 1 row c_sq
_R_CB = _R_CBT + NUM_CODEBOOKS * _CBT_ROWS        # plain codebooks [K_PAD, H]
SLAB_ROWS = _align8(_R_CB + NUM_CODEBOOKS * K_PAD)

# ---- packed output-slab lane offsets ----
_C_Q = 0                                          # quantized          [H]
_C_REC = _C_Q + HIDDEN_DIM                        # reconstructed      [INPUT_DIM]
_C_IDX = _C_REC + INPUT_DIM                       # indices (as f32)   [NC]
_C_RSQ = _C_IDX + NUM_CODEBOOKS                   # per-row sum (rec-x)^2
_C_CSQ = _C_RSQ + 1                               # per-row sum residual^2 (all lvls)
_C_PAD = LANES - (_C_CSQ + 1)


# ------------------------------- kernel -----------------------------------
def rvq_kernel(x_ref, slab_ref, out_ref):
    f32 = jnp.float32
    Din, H, H2 = INPUT_DIM, HIDDEN_DIM, 2 * HIDDEN_DIM

    x = x_ref[...]                                            # [TB, Din]
    TB = x.shape[0]

    # -------- unpack parameter slab (static, sublane-aligned slices) --------
    w1 = slab_ref[_R_W1:_R_W1 + Din, 0:H2]
    w2 = slab_ref[_R_W2:_R_W2 + H2, 0:H]
    w3 = slab_ref[_R_W3:_R_W3 + H, 0:H2]
    w4 = slab_ref[_R_W4:_R_W4 + H2, 0:Din]
    brows = slab_ref[_R_B:_R_B + 8, :]                        # one aligned load
    b1 = brows[0:1, 0:H2]
    b2 = brows[1:2, 0:H]
    b3 = brows[2:3, 0:H2]
    b4 = brows[3:4, 0:Din]

    # ---------------- encoder MLP ----------------
    h1 = jnp.maximum(jnp.dot(x, w1, preferred_element_type=f32) + b1, 0.0)
    h = jnp.dot(h1, w2, preferred_element_type=f32) + b2      # [TB, H]

    lane_iota = lax.broadcasted_iota(jnp.int32, (TB, K_PAD), 1)

    residual = h
    quantized = jnp.zeros_like(h)
    sq_acc = jnp.zeros_like(h)                                # commitment accum
    idx_cols = []

    # ---------------- residual VQ levels (static unroll) ----------------
    for i in range(NUM_CODEBOOKS):
        tbase = _R_CBT + i * _CBT_ROWS
        cbt_m2 = slab_ref[tbase:tbase + H, :]                 # [H, K_PAD] = -2*C^T
        c_sq = slab_ref[tbase + H:tbase + H + 1, :]           # [1, K_PAD] (+sentinel)
        cbase = _R_CB + i * K_PAD
        cb = slab_ref[cbase:cbase + K_PAD, 0:H]               # [K_PAD, H]

        # argmin-equivalent distance: ||c||^2 - 2<r,c>  (r^2 row-constant dropped)
        dist = jnp.dot(residual, cbt_m2, preferred_element_type=f32) + c_sq

        # argmin with first-occurrence tie-break (matches torch.argmin)
        dmin = jnp.min(dist, axis=1, keepdims=True)
        is_min = dist <= dmin
        min_idx = jnp.min(jnp.where(is_min, lane_iota, K_PAD),
                          axis=1, keepdims=True)              # [TB, 1] int32
        idx_cols.append(min_idx.astype(f32))

        # gather codebook rows via one-hot matmul (canonical MXU orientation)
        onehot = (lane_iota == min_idx).astype(f32)           # [TB, K_PAD]
        selected = jnp.dot(onehot, cb, preferred_element_type=f32)

        residual = residual - selected
        quantized = quantized + selected
        sq_acc = sq_acc + residual * residual                 # VPU only

    # ---------------- decoder MLP ----------------
    d1 = jnp.maximum(jnp.dot(quantized, w3, preferred_element_type=f32) + b3, 0.0)
    rec = jnp.dot(d1, w4, preferred_element_type=f32) + b4    # [TB, Din]

    # ---------------- per-row loss partials (2 XLU reduces total) ----------
    diff = rec - x
    rec_row = jnp.sum(diff * diff, axis=1, keepdims=True)     # [TB, 1]
    com_row = jnp.sum(sq_acc, axis=1, keepdims=True)          # [TB, 1]

    # ---------------- single lane-dense packed store ----------------
    out_ref[...] = jnp.concatenate(
        [quantized, rec] + idx_cols
        + [rec_row, com_row, jnp.zeros((TB, _C_PAD), f32)],
        axis=1)


# ------------------------------- wrapper -----------------------------------
@jax.jit
def rvq_forward(x, slab):
    B = x.shape[0]
    n_tiles = pl.cdiv(B, BATCH_TILE)
    Bp = n_tiles * BATCH_TILE
    x_in = x if Bp == B else jnp.zeros((Bp, INPUT_DIM), x.dtype).at[:B].set(x)

    flops_per_row = 2 * (INPUT_DIM * 2 * HIDDEN_DIM
                         + 2 * HIDDEN_DIM * HIDDEN_DIM
                         + NUM_CODEBOOKS * 2 * HIDDEN_DIM * K_PAD
                         + HIDDEN_DIM * 2 * HIDDEN_DIM
                         + 2 * HIDDEN_DIM * INPUT_DIM)
    bytes_accessed = 4 * (Bp * INPUT_DIM + Bp * LANES + SLAB_ROWS * LANES)

    out = pl.pallas_call(
        rvq_kernel,
        out_shape=jax.ShapeDtypeStruct((Bp, LANES), jnp.float32),
        grid_spec=pltpu.PrefetchScalarGridSpec(
            num_scalar_prefetch=0,
            grid=(n_tiles,),
            in_specs=[
                pl.BlockSpec((BATCH_TILE, INPUT_DIM), lambda i: (i, 0)),
                pl.BlockSpec((SLAB_ROWS, LANES), lambda i: (0, 0)),
            ],
            out_specs=pl.BlockSpec((BATCH_TILE, LANES), lambda i: (i, 0)),
        ),
        compiler_params=pltpu.CompilerParams(
            dimension_semantics=("parallel",)),
        cost_estimate=pl.CostEstimate(
            flops=Bp * flops_per_row, transcendentals=0,
            bytes_accessed=bytes_accessed),
    )(x_in, slab)

    out = out[:B]
    quantized = out[:, _C_Q:_C_Q + HIDDEN_DIM]
    reconstructed = out[:, _C_REC:_C_REC + INPUT_DIM]
    indices = out[:, _C_IDX:_C_IDX + NUM_CODEBOOKS].astype(jnp.int32)  # [B, NC]
    # loss = mean((rec-x)^2) + 0.5 * sum_i 2*mean(residual_after_i^2)
    loss = (jnp.sum(out[:, _C_RSQ]) / (B * INPUT_DIM)
            + jnp.sum(out[:, _C_CSQ]) / (B * HIDDEN_DIM))
    return quantized, indices, reconstructed, loss


# --------------------------- parameter init --------------------------------
def init_params(key, input_dim, hidden_dim, codebook_size, num_codebooks):
    ks = jax.random.split(key, 9)

    def linear(kw, kb, fan_in, fan_out):
        bound = 1.0 / jnp.sqrt(jnp.float32(fan_in))
        w = jax.random.uniform(kw, (fan_in, fan_out), jnp.float32, -bound, bound)
        b = jax.random.uniform(kb, (fan_out,), jnp.float32, -bound, bound)
        return w, b

    w1, b1 = linear(ks[0], ks[1], input_dim, hidden_dim * 2)
    w2, b2 = linear(ks[2], ks[3], hidden_dim * 2, hidden_dim)
    w3, b3 = linear(ks[4], ks[5], hidden_dim, hidden_dim * 2)
    w4, b4 = linear(ks[6], ks[7], hidden_dim * 2, input_dim)
    codebooks = jax.random.normal(
        ks[8], (num_codebooks, codebook_size, hidden_dim), jnp.float32)

    slab = jnp.zeros((SLAB_ROWS, LANES), jnp.float32)
    slab = slab.at[_R_W1:_R_W1 + input_dim, 0:hidden_dim * 2].set(w1)
    slab = slab.at[_R_W2:_R_W2 + hidden_dim * 2, 0:hidden_dim].set(w2)
    slab = slab.at[_R_W3:_R_W3 + hidden_dim, 0:hidden_dim * 2].set(w3)
    slab = slab.at[_R_W4:_R_W4 + hidden_dim * 2, 0:input_dim].set(w4)
    slab = slab.at[_R_B + 0, 0:hidden_dim * 2].set(b1)
    slab = slab.at[_R_B + 1, 0:hidden_dim].set(b2)
    slab = slab.at[_R_B + 2, 0:hidden_dim * 2].set(b3)
    slab = slab.at[_R_B + 3, 0:input_dim].set(b4)

    pad_mask = jnp.arange(K_PAD) >= codebook_size
    for i in range(num_codebooks):
        cb_pad = jnp.zeros((K_PAD, hidden_dim), jnp.float32)
        cb_pad = cb_pad.at[:codebook_size, :].set(codebooks[i])
        c_sq = jnp.sum(cb_pad * cb_pad, axis=1)
        c_sq = jnp.where(pad_mask, jnp.float32(1e30), c_sq)   # pad sentinel
        tbase = _R_CBT + i * _CBT_ROWS
        slab = slab.at[tbase:tbase + hidden_dim, :].set(-2.0 * cb_pad.T)
        slab = slab.at[tbase + hidden_dim, :].set(c_sq)
        cbase = _R_CB + i * K_PAD
        slab = slab.at[cbase:cbase + K_PAD, 0:hidden_dim].set(cb_pad)

    return dict(slab=slab,
                w1=w1, b1=b1, w2=w2, b2=b2, w3=w3, b3=b3, w4=w4, b4=b4,
                codebooks=codebooks)


# --------------------------- pure-JAX reference -----------------------------
def rvq_reference(x, p):
    h1 = jnp.maximum(x @ p["w1"] + p["b1"], 0.0)
    h = h1 @ p["w2"] + p["b2"]
    residual = h
    quantized = jnp.zeros_like(h)
    idx_list = []
    com = jnp.float32(0.0)
    for i in range(NUM_CODEBOOKS):
        cb = p["codebooks"][i]
        d = jnp.sum((residual[:, None, :] - cb[None, :, :]) ** 2, axis=-1)
        mi = jnp.argmin(d, axis=1)
        idx_list.append(mi.astype(jnp.int32))
        sel = cb[mi]
        residual = residual - sel
        quantized = quantized + sel
        com = com + 2.0 * jnp.mean(residual ** 2)
    d1 = jnp.maximum(quantized @ p["w3"] + p["b3"], 0.0)
    rec = d1 @ p["w4"] + p["b4"]
    loss = jnp.mean((rec - x) ** 2) + 0.5 * com
    return quantized, jnp.stack(idx_list, axis=1), rec, loss


# --------------------------------- main -------------------------------------
if __name__ == "__main__":
    BATCH = 64
    key = jax.random.PRNGKey(0)
    k_x, k_p = jax.random.split(key)

    x = jax.random.normal(k_x, (BATCH, INPUT_DIM), jnp.float32)
    params = init_params(k_p, INPUT_DIM, HIDDEN_DIM, CODEBOOK_SIZE, NUM_CODEBOOKS)

    quantized, indices, reconstructed, loss = rvq_forward(x, params["slab"])
    jax.block_until_ready((quantized, indices, reconstructed, loss))

    assert quantized.shape == (BATCH, HIDDEN_DIM)
    assert indices.shape == (BATCH, NUM_CODEBOOKS)
    assert reconstructed.shape == (BATCH, INPUT_DIM)
    assert loss.shape == ()

    # correctness check against a pure-JAX reference of the PyTorch forward
    q_ref, i_ref, r_ref, l_ref = rvq_reference(x, params)
    assert jnp.array_equal(indices, i_ref), "index mismatch vs reference"
    assert jnp.allclose(quantized, q_ref, atol=1e-4, rtol=1e-4)
    assert jnp.allclose(reconstructed, r_ref, atol=1e-4, rtol=1e-4)
    assert jnp.allclose(loss, l_ref, atol=1e-4, rtol=1e-4)

    print("KERNEL_OK")
</pallas_src>

<mosaic_0001>
module attributes {stable_mosaic.version = 11 : i64} {
  func.func @rvq_kernel(%arg0: i32, %arg1: memref<32x32xf32, #tpu.memory_space<vmem>>, %arg2: memref<576x128xf32, #tpu.memory_space<vmem>>, %arg3: memref<32x128xf32, #tpu.memory_space<vmem>>) attributes {dimension_semantics = [#tpu.dimension_semantics<parallel>], iteration_bounds = array<i64: 2>, scalar_prefetch = 0 : i64, scratch_operands = 0 : i64, tpu.core_type = #tpu.core_type<tc>, window_params = [{transform_indices = @transform_0, window_bounds = array<i64: 32, 32>}, {pipeline_mode = #tpu.pipeline_mode<synchronous>, transform_indices = @transform_1, window_bounds = array<i64: 576, 128>}, {transform_indices = @transform_2, window_bounds = array<i64: 32, 128>}]} {
    %c0 = arith.constant 0 : index
    %c0_0 = arith.constant 0 : index
    %0 = vector.load %arg1[%c0, %c0_0] : memref<32x32xf32, #tpu.memory_space<vmem>>, vector<32x32xf32>
    %c0_1 = arith.constant 0 : index
    %c0_2 = arith.constant 0 : index
    %1 = vector.load %arg2[%c0_1, %c0_2] : memref<576x128xf32, #tpu.memory_space<vmem>>, vector<32x32xf32>
    %c32 = arith.constant 32 : index
    %c0_3 = arith.constant 0 : index
    %2 = vector.load %arg2[%c32, %c0_3] : memref<576x128xf32, #tpu.memory_space<vmem>>, vector<32x16xf32>
    %c64 = arith.constant 64 : index
    %c0_4 = arith.constant 0 : index
    %3 = vector.load %arg2[%c64, %c0_4] : memref<576x128xf32, #tpu.memory_space<vmem>>, vector<16x32xf32>
    %c80 = arith.constant 80 : index
    %c0_5 = arith.constant 0 : index
    %4 = vector.load %arg2[%c80, %c0_5] : memref<576x128xf32, #tpu.memory_space<vmem>>, vector<32x32xf32>
    %c112 = arith.constant 112 : index
    %c0_6 = arith.constant 0 : index
    %5 = vector.load %arg2[%c112, %c0_6] : memref<576x128xf32, #tpu.memory_space<vmem>>, vector<8x128xf32>
    %6 = vector.extract_strided_slice %5 {offsets = [0, 0], sizes = [1, 32], strides = [1, 1]} : vector<8x128xf32> to vector<1x32xf32>
    %7 = vector.extract_strided_slice %5 {offsets = [1, 0], sizes = [1, 16], strides = [1, 1]} : vector<8x128xf32> to vector<1x16xf32>
    %8 = vector.extract_strided_slice %5 {offsets = [2, 0], sizes = [1, 32], strides = [1, 1]} : vector<8x128xf32> to vector<1x32xf32>
    %9 = vector.extract_strided_slice %5 {offsets = [3, 0], sizes = [1, 32], strides = [1, 1]} : vector<8x128xf32> to vector<1x32xf32>
    %cst = arith.constant dense<0.000000e+00> : vector<32x32xf32>
    %10 = tpu.matmul %0, %1, %cst {dimension_numbers = #tpu.dot_dimension_numbers<[1], [0], [0], [1], [0, 0, 1, 1], [], []>} : vector<32x32xf32>, vector<32x32xf32>, vector<32x32xf32> -> vector<32x32xf32>
    %11 = vector.broadcast %6 : vector<1x32xf32> to vector<32x32xf32>
    %12 = arith.addf %10, %11 : vector<32x32xf32>
    %cst_7 = arith.constant 0.000000e+00 : f32
    %13 = vector.broadcast %cst_7 : f32 to vector<32x32xf32>
    %14 = arith.maximumf %12, %13 : vector<32x32xf32>
    %cst_8 = arith.constant dense<0.000000e+00> : vector<32x16xf32>
    %15 = tpu.matmul %14, %2, %cst_8 {dimension_numbers = #tpu.dot_dimension_numbers<[1], [0], [0], [1], [0, 0, 1, 1], [], []>} : vector<32x32xf32>, vector<32x16xf32>, vector<32x16xf32> -> vector<32x16xf32>
    %16 = vector.broadcast %7 : vector<1x16xf32> to vector<32x16xf32>
    %17 = arith.addf %15, %16 : vector<32x16xf32>
    %18 = tpu.iota {dimensions = array<i32: 1>} : vector<32x128xi32>
    %cst_9 = arith.constant 0.000000e+00 : f32
    %19 = vector.broadcast %cst_9 : f32 to vector<32x16xf32>
    %cst_10 = arith.constant 0.000000e+00 : f32
    %20 = vector.broadcast %cst_10 : f32 to vector<32x16xf32>
    %c120 = arith.constant 120 : index
    %c0_11 = arith.constant 0 : index
    %21 = vector.load %arg2[%c120, %c0_11] : memref<576x128xf32, #tpu.memory_space<vmem>>, vector<16x128xf32>
    %c136 = arith.constant 136 : index
    %c0_12 = arith.constant 0 : index
    %22 = vector.load %arg2[%c136, %c0_12] : memref<576x128xf32, #tpu.memory_space<vmem>>, vector<1x128xf32>
    %c192 = arith.constant 192 : index
    %c0_13 = arith.constant 0 : index
    %23 = vector.load %arg2[%c192, %c0_13] : memref<576x128xf32, #tpu.memory_space<vmem>>, vector<128x16xf32>
    %cst_14 = arith.constant dense<0.000000e+00> : vector<32x128xf32>
    %24 = tpu.matmul %17, %21, %cst_14 {dimension_numbers = #tpu.dot_dimension_numbers<[1], [0], [0], [1], [0, 0, 1, 1], [], []>} : vector<32x16xf32>, vector<16x128xf32>, vector<32x128xf32> -> vector<32x128xf32>
    %25 = vector.broadcast %22 : vector<1x128xf32> to vector<32x128xf32>
    %26 = arith.addf %24, %25 : vector<32x128xf32>
    %cst_15 = arith.constant dense<0x7F800000> : vector<32xf32>
    %27 = vector.multi_reduction <minimumf>, %26, %cst_15 [1] : vector<32x128xf32> to vector<32xf32>
    %28 = vector.shape_cast %27 : vector<32xf32> to vector<32x1xf32>
    %29 = vector.broadcast %28 : vector<32x1xf32> to vector<32x128xf32>
    %30 = arith.cmpf ole, %26, %29 : vector<32x128xf32>
    %c128_i32 = arith.constant 128 : i32
    %31 = vector.broadcast %c128_i32 : i32 to vector<32x128xi32>
    %32 = arith.select %30, %18, %31 : vector<32x128xi1>, vector<32x128xi32>
    %cst_16 = arith.constant dense<2147483647> : vector<32xi32>
    %33 = vector.multi_reduction <minsi>, %32, %cst_16 [1] : vector<32x128xi32> to vector<32xi32>
    %34 = vector.shape_cast %33 : vector<32xi32> to vector<32x1xi32>
    %35 = arith.sitofp %34 : vector<32x1xi32> to vector<32x1xf32>
    %36 = vector.broadcast %34 : vector<32x1xi32> to vector<32x128xi32>
    %37 = arith.cmpi eq, %18, %36 : vector<32x128xi32>
    %38 = arith.extui %37 : vector<32x128xi1> to vector<32x128xi32>
    %39 = arith.sitofp %38 : vector<32x128xi32> to vector<32x128xf32>
    %cst_17 = arith.constant dense<0.000000e+00> : vector<32x16xf32>
    %40 = tpu.matmul %39, %23, %cst_17 {dimension_numbers = #tpu.dot_dimension_numbers<[1], [0], [0], [1], [0, 0, 1, 1], [], []>} : vector<32x128xf32>, vector<128x16xf32>, vector<32x16xf32> -> vector<32x16xf32>
    %41 = arith.subf %17, %40 : vector<32x16xf32>
    %42 = arith.addf %19, %40 : vector<32x16xf32>
    %43 = arith.mulf %41, %41 : vector<32x16xf32>
    %44 = arith.addf %20, %43 : vector<32x16xf32>
    %c144 = arith.constant 144 : index
    %c0_18 = arith.constant 0 : index
    %45 = vector.load %arg2[%c144, %c0_18] : memref<576x128xf32, #tpu.memory_space<vmem>>, vector<16x128xf32>
    %c160 = arith.constant 160 : index
    %c0_19 = arith.constant 0 : index
    %46 = vector.load %arg2[%c160, %c0_19] : memref<576x128xf32, #tpu.memory_space<vmem>>, vector<1x128xf32>
    %c320 = arith.constant 320 : index
    %c0_20 = arith.constant 0 : index
    %47 = vector.load %arg2[%c320, %c0_20] : memref<576x128xf32, #tpu.memory_space<vmem>>, vector<128x16xf32>
    %cst_21 = arith.constant dense<0.000000e+00> : vector<32x128xf32>
    %48 = tpu.matmul %41, %45, %cst_21 {dimension_numbers = #tpu.dot_dimension_numbers<[1], [0], [0], [1], [0, 0, 1, 1], [], []>} : vector<32x16xf32>, vector<16x128xf32>, vector<32x128xf32> -> vector<32x128xf32>
    %49 = vector.broadcast %46 : vector<1x128xf32> to vector<32x128xf32>
    %50 = arith.addf %48, %49 : vector<32x128xf32>
    %cst_22 = arith.constant dense<0x7F800000> : vector<32xf32>
    %51 = vector.multi_reduction <minimumf>, %50, %cst_22 [1] : vector<32x128xf32> to vector<32xf32>
    %52 = vector.shape_cast %51 : vector<32xf32> to vector<32x1xf32>
    %53 = vector.broadcast %52 : vector<32x1xf32> to vector<32x128xf32>
    %54 = arith.cmpf ole, %50, %53 : vector<32x128xf32>
    %c128_i32_23 = arith.constant 128 : i32
    %55 = vector.broadcast %c128_i32_23 : i32 to vector<32x128xi32>
    %56 = arith.select %54, %18, %55 : vector<32x128xi1>, vector<32x128xi32>
    %cst_24 = arith.constant dense<2147483647> : vector<32xi32>
    %57 = vector.multi_reduction <minsi>, %56, %cst_24 [1] : vector<32x128xi32> to vector<32xi32>
    %58 = vector.shape_cast %57 : vector<32xi32> to vector<32x1xi32>
    %59 = arith.sitofp %58 : vector<32x1xi32> to vector<32x1xf32>
    %60 = vector.broadcast %58 : vector<32x1xi32> to vector<32x128xi32>
    %61 = arith.cmpi eq, %18, %60 : vector<32x128xi32>
    %62 = arith.extui %61 : vector<32x128xi1> to vector<32x128xi32>
    %63 = arith.sitofp %62 : vector<32x128xi32> to vector<32x128xf32>
    %cst_25 = arith.constant dense<0.000000e+00> : vector<32x16xf32>
    %64 = tpu.matmul %63, %47, %cst_25 {dimension_numbers = #tpu.dot_dimension_numbers<[1], [0], [0], [1], [0, 0, 1, 1], [], []>} : vector<32x128xf32>, vector<128x16xf32>, vector<32x16xf32> -> vector<32x16xf32>
    %65 = arith.subf %41, %64 : vector<32x16xf32>
    %66 = arith.addf %42, %64 : vector<32x16xf32>
    %67 = arith.mulf %65, %65 : vector<32x16xf32>
    %68 = arith.addf %44, %67 : vector<32x16xf32>
    %c168 = arith.constant 168 : index
    %c0_26 = arith.constant 0 : index
    %69 = vector.load %arg2[%c168, %c0_26] : memref<576x128xf32, #tpu.memory_space<vmem>>, vector<16x128xf32>
    %c184 = arith.constant 184 : index
    %c0_27 = arith.constant 0 : index
    %70 = vector.load %arg2[%c184, %c0_27] : memref<576x128xf32, #tpu.memory_space<vmem>>, vector<1x128xf32>
    %c448 = arith.constant 448 : index
    %c0_28 = arith.constant 0 : index
    %71 = vector.load %arg2[%c448, %c0_28] : memref<576x128xf32, #tpu.memory_space<vmem>>, vector<128x16xf32>
    %cst_29 = arith.constant dense<0.000000e+00> : vector<32x128xf32>
    %72 = tpu.matmul %65, %69, %cst_29 {dimension_numbers = #tpu.dot_dimension_numbers<[1], [0], [0], [1], [0, 0, 1, 1], [], []>} : vector<32x16xf32>, vector<16x128xf32>, vector<32x128xf32> -> vector<32x128xf32>
    %73 = vector.broadcast %70 : vector<1x128xf32> to vector<32x128xf32>
    %74 = arith.addf %72, %73 : vector<32x128xf32>
    %cst_30 = arith.constant dense<0x7F800000> : vector<32xf32>
    %75 = vector.multi_reduction <minimumf>, %74, %cst_30 [1] : vector<32x128xf32> to vector<32xf32>
    %76 = vector.shape_cast %75 : vector<32xf32> to vector<32x1xf32>
    %77 = vector.broadcast %76 : vector<32x1xf32> to vector<32x128xf32>
    %78 = arith.cmpf ole, %74, %77 : vector<32x128xf32>
    %c128_i32_31 = arith.constant 128 : i32
    %79 = vector.broadcast %c128_i32_31 : i32 to vector<32x128xi32>
    %80 = arith.select %78, %18, %79 : vector<32x128xi1>, vector<32x128xi32>
    %cst_32 = arith.constant dense<2147483647> : vector<32xi32>
    %81 = vector.multi_reduction <minsi>, %80, %cst_32 [1] : vector<32x128xi32> to vector<32xi32>
    %82 = vector.shape_cast %81 : vector<32xi32> to vector<32x1xi32>
    %83 = arith.sitofp %82 : vector<32x1xi32> to vector<32x1xf32>
    %84 = vector.broadcast %82 : vector<32x1xi32> to vector<32x128xi32>
    %85 = arith.cmpi eq, %18, %84 : vector<32x128xi32>
    %86 = arith.extui %85 : vector<32x128xi1> to vector<32x128xi32>
    %87 = arith.sitofp %86 : vector<32x128xi32> to vector<32x128xf32>
    %cst_33 = arith.constant dense<0.000000e+00> : vector<32x16xf32>
    %88 = tpu.matmul %87, %71, %cst_33 {dimension_numbers = #tpu.dot_dimension_numbers<[1], [0], [0], [1], [0, 0, 1, 1], [], []>} : vector<32x128xf32>, vector<128x16xf32>, vector<32x16xf32> -> vector<32x16xf32>
    %89 = arith.subf %65, %88 : vector<32x16xf32>
    %90 = arith.addf %66, %88 : vector<32x16xf32>
    %91 = arith.mulf %89, %89 : vector<32x16xf32>
    %92 = arith.addf %68, %91 : vector<32x16xf32>
    %cst_34 = arith.constant dense<0.000000e+00> : vector<32x32xf32>
    %93 = tpu.matmul %90, %3, %cst_34 {dimension_numbers = #tpu.dot_dimension_numbers<[1], [0], [0], [1], [0, 0, 1, 1], [], []>} : vector<32x16xf32>, vector<16x32xf32>, vector<32x32xf32> -> vector<32x32xf32>
    %94 = vector.broadcast %8 : vector<1x32xf32> to vector<32x32xf32>
    %95 = arith.addf %93, %94 : vector<32x32xf32>
    %cst_35 = arith.constant 0.000000e+00 : f32
    %96 = vector.broadcast %cst_35 : f32 to vector<32x32xf32>
    %97 = arith.maximumf %95, %96 : vector<32x32xf32>
    %cst_36 = arith.constant dense<0.000000e+00> : vector<32x32xf32>
    %98 = tpu.matmul %97, %4, %cst_36 {dimension_numbers = #tpu.dot_dimension_numbers<[1], [0], [0], [1], [0, 0, 1, 1], [], []>} : vector<32x32xf32>, vector<32x32xf32>, vector<32x32xf32> -> vector<32x32xf32>
    %99 = vector.broadcast %9 : vector<1x32xf32> to vector<32x32xf32>
    %100 = arith.addf %98, %99 : vector<32x32xf32>
    %101 = arith.subf %100, %0 : vector<32x32xf32>
    %102 = arith.mulf %101, %101 : vector<32x32xf32>
    %cst_37 = arith.constant dense<0.000000e+00> : vector<32xf32>
    %103 = vector.multi_reduction <add>, %102, %cst_37 [1] : vector<32x32xf32> to vector<32xf32>
    %104 = vector.shape_cast %103 : vector<32xf32> to vector<32x1xf32>
    %cst_38 = arith.constant dense<0.000000e+00> : vector<32xf32>
    %105 = vector.multi_reduction <add>, %92, %cst_38 [1] : vector<32x16xf32> to vector<32xf32>
    %106 = vector.shape_cast %105 : vector<32xf32> to vector<32x1xf32>
    %cst_39 = arith.constant 0.000000e+00 : f32
    %107 = vector.broadcast %cst_39 : f32 to vector<32x75xf32>
    %108 = tpu.concatenate %90, %100, %35, %59, %83, %104, %106, %107 in 1 : vector<32x16xf32>, vector<32x32xf32>, vector<32x1xf32>, vector<32x1xf32>, vector<32x1xf32>, vector<32x1xf32>, vector<32x1xf32>, vector<32x75xf32> -> vector<32x128xf32>
    %c0_40 = arith.constant 0 : index
    %c0_41 = arith.constant 0 : index
    %109 = vector.load %arg3[%c0_40, %c0_41] : memref<32x128xf32, #tpu.memory_space<vmem>>, vector<32x128xf32>
    tpu.vector_store %arg3[%c0_40, %c0_41], %108 {strides = array<i32>} : memref<32x128xf32, #tpu.memory_space<vmem>>, vector<32x128xf32>,
    return
  }
  func.func @transform_0(%arg0: i32) -> (i32, i32) {
    %c0_i32 = arith.constant 0 : i32
    %c0_i32_0 = arith.constant 0 : i32
    return %arg0, %c0_i32 : i32, i32
  }
  func.func @transform_1(%arg0: i32) -> (i32, i32) {
    %c0_i32 = arith.constant 0 : i32
    %c0_i32_0 = arith.constant 0 : i32
    %c0_i32_1 = arith.constant 0 : i32
    return %c0_i32, %c0_i32_0 : i32, i32
  }
  func.func @transform_2(%arg0: i32) -> (i32, i32) {
    %c0_i32 = arith.constant 0 : i32
    %c0_i32_0 = arith.constant 0 : i32
    return %arg0, %c0_i32 : i32, i32
  }
}

</mosaic_0001>

<bundles_post_ra>
// kernel: rvq_forward.1
= control target key start
LH: loop header
LB: loop body
LE: loop exit
PB: predicated region body
PF: predicated region fallthrough
CT: control target
= control target key end

     0   :  { %7 = vsyncpa [#allocation3], 0  ;;  %s2274_s9 = smov 0   ;;  %s2614_s0 = inlined_call_operand.vmem [shape: f32[64,32], index: 0, kind: input, shape index: {}]   ;;  %s2615_s1 = inlined_call_operand.hbm [shape: f32[576,128], index: 1, kind: input, shape index: {}]   ;;  %s2616_s2 = inlined_call_operand.vmem [shape: f32[64,128], index: 2, kind: output, shape index: {}]  }
   0x1 LB: > { %s1678_s10 = sadd.s32 4294967295, %s2252_s9   ;;  %p1680_p0 = scmp.ge.s32.totalorder %s2252_s9, 1  ;;  %s2252_s9 = sphi %s2274_s9, %s13_s9  }
   0x2   : > { %p91_p1 = scmp.lt.s32.totalorder %s2252_s9, 3  ;;  %s2254_s11 = smov [#allocation2]  }
   0x3   : > { %s103_s12 = sshll.u32 %s2254_s11, 4  ;;  %p2288_p3 = scmp.eq.s32.totalorder %s1678_s10, 0  ;;  %s104_s12 = int_to_ptr.vmem [resolvable:$true] %s103_s12 }
   0x4   : > { %p2282_p2 = pnand %p1680_p0, %p91_p1  ;;  %s2214_s18 = scalar_lea.hbm %s2615_s1, 9216 }
   0x5   : > { %s2621_s14 = scalar_select %p2288_p3, 1, 0 }
   0x6   : > { %s2620_s13 = scalar_select %p2282_p2, 1, 0 }
   0x7   : > { %p2190_p4 = pneg %p2282_p2  ;;  %p2215_p6 = scmp.ne.s32.totalorder %s2615_s1, %s2214_s18 }
   0x8   : > { %p2221_p10 = scmp.lt.u32.totalorder %s2214_s18, %s2615_s1 }
   0x9   : > { %p2296_p5 = pnand %p2288_p3, %p2190_p4 }
   0xb   : > { %p2216_p7 = pneg %p2296_p5 }
   0xd   : > { %p2217_p8 = pnand %p2216_p7, %p2215_p6 }
   0xf   : > { %p2218_p9 = pneg %p2217_p8 }
  0x11   : > { %p2223_p11 = pnand %p2221_p10, %p2218_p9 }
  0x13   : > { %2226 = shalt.err (!%p2223_p11)
}
  0x14   : > { %s2227_s23 = scalar_lea.vmem %s104_s12, 9216  ;;  %p2235_p1 = scmp.lt.s32.totalorder %s104_s12, %s104_s12 }
  0x15   : > { %p2228_p12 = scmp.ne.s32.totalorder %s104_s12, %s2227_s23  ;;  %p2236_p4 = scmp.lt.s32.totalorder %s2227_s23, %s2227_s23 }
  0x17   : > { %p2230_p13 = pnand %p2228_p12, %p2216_p7  ;;  %p2237_p3 = por %p2236_p4, %p2235_p1 }
  0x19   : > { %p2231_p0 = pneg %p2230_p13 }
  0x1b   : > { %p2238_p2 = pnand %p2237_p3, %p2231_p0 }
  0x1d   : > { %2241 = shalt.err (!%p2238_p2)
}
  0x1e   : > { %s2255_s24 = smov 128   ;;  %s2256_s25 = smov 8  }
  0x1f   : > { %2193 = dma.hbm_to_vmem [thread:$0]  (!%p2296_p5), %s2615_s1, 9216, %s104_s12, [#allocation3], %s2255_s24, %s2255_s24, %s2256_s25  }
  0x20   : > { %p2623_p6 = scmp.ne.s32.totalorder %s2620_s13, 0 }
  0x21   : > { %p2624_p8 = scmp.ne.s32.totalorder (!%p2623_p6), %s2621_s14, 0 }
  0x22   : > { %128 = sbr.rel (%p2623_p6) target bundleno = 3755 (0xeab), region = 28 }
  0x29   : > { %2247 = dma.done.wait (%p2624_p8), [#allocation3], 9216  }
  0x2a   : > { %2249 = vsyncadd (%p2624_p8), [#allocation3], 4294958080  ;;  %s1685_s28 = sshll.u32 %s1678_s10, 2  ;;  %vm185_vm0 = vcmask 261120   ;;  %v166_v0 = vld [vmem:[#allocation2] sm:$0xff]  ;;  %v167_v1 = vld [vmem:[#allocation2 + $0x8] sm:$0xff]  ;;  %v181_v19 = vlaneseq }
  0x2b   : > { %p151_p2 = scmp.lt.s32.totalorder %s1685_s28, 7  ;;  %v168_v2 = vld [vmem:[#allocation2 + $0x10] sm:$0xff]  ;;  %v2050_v3 = vpack.c.bf16 %v167_v1, %v166_v0  ;;  %v169_v4 = vld [vmem:[#allocation2 + $0x18] sm:$0xff]  ;;  %v170_v7 = vld [vmem:[#allocation2 + $0x20] sm:$0xff]  ;;  %vm413_vm1 = vcmask 130048   ;;  %s2258_s5 = smov 16  }
  0x2c   : > { %v2054_v6 = vpack.c.bf16 %v169_v4, %v168_v2  ;;  %v171_v8 = vld [vmem:[#allocation2 + $0x28] sm:$0xff]  ;;  %v172_v13 = vld [vmem:[#allocation2 + $0x30] sm:$0xff]  ;;  %v173_v14 = vld [vmem:[#allocation2 + $0x38] sm:$0xff]  ;;  %v2342_v20 = vshrl.u32 %v181_v19, 7  ;;  %v2366_v55 = vand.u32 127, %v181_v19 }
  0x2d   : > { %s2626_s28 = smov (!%p151_p2, %s1685_s28), 7  ;;  %2051 = vmatprep.subr.bf16.mxu0 %v2050_v3  ;;  %v2058_v9 = vpack.c.bf16 %v171_v8, %v170_v7  ;;  %v2062_v15 = vpack.c.bf16 %v173_v14, %v172_v13  ;;  %v390_v16 = vld [vmem:[#allocation2 + $0x78] sm:$0xff]  ;;  %v391_v17 = vld [vmem:[#allocation2 + $0x80] sm:$0xff]  ;;  %v180_v22 = vld [vmem:[#allocation2 + $0x70] sm:$0xff] }
  0x2e   : > { %s1686_s29 = sshll.u32 %s2626_s28, 3  ;;  %2053 = vmatpush3.bf16.msra.mxu0 %v2050_v3  ;;  %v2066_v18 = vpack.c.bf16 %v391_v17, %v390_v16  ;;  %v183_v21 = vsub.s32 0, %v2342_v20  ;;  %v289_v36 = vsub.s32 1, %v2342_v20  ;;  %v1697_v46 = vld [vmem:[#allocation2 + $0x88] ss:$0 sm:$0xff]  ;;  %v393_v8 = vld [vmem:[#allocation2 + $0xc0] sm:$0xff] }
  0x2f   : > { %s2332_s4 = scalar_lea.vmem %s2614_s0, %s1686_s29  ;;  %2055 = vmatprep.subr.bf16.mxu0 %v2054_v6  ;;  %2059 = vmatprep.subr.bf16.mxu1 %v2058_v9  ;;  %v397_v14 = vld [vmem:[#allocation2 + $0xe0] sm:$0xff]  ;;  %v399_v17 = vld [vmem:[#allocation2 + $0xf0] sm:$0xff]  ;;  %s160_s8 = scalar_lea.vmem %s2616_s2, %s1686_s29 }
  0x30   : > { %v162_v5 = vld [vmem:[%s2332_s4] sm:$0xff]  ;;  %2061 = vmatpush3.bf16.msra.mxu1 %v2058_v9  ;;  %v163_v10 = vld [vmem:[%s2332_s4 + $0x8] sm:$0xff]  ;;  %v164_v11 = vld [vmem:[%s2332_s4 + $0x10] sm:$0xff]  ;;  %v184_v23 = vrot.slane %v180_v22, %v183_v21  ;;  %v290_v37 = vrot.slane %v180_v22, %v289_v36 }
  0x31   : > { %1862 = vmatprep.mubr.msk.f32.mxu0 %vm185_vm0, %v162_v5  ;;  %v165_v12 = vld [vmem:[%s2332_s4 + $0x18] sm:$0xff]  ;;  %2063 = vmatprep.subr.bf16.mxu1 %v2062_v15  ;;  %v394_v9 = vld [vmem:[#allocation2 + $0xc8] sm:$0xff]  ;;  %v401_v21 = vld [vmem:[#allocation2 + $0x100] sm:$0xff] }
  0x32   : > { %2057 = vmatpush3.bf16.msra.mxu0 %v2054_v6  ;;  %v402_v22 = vld [vmem:[#allocation2 + $0x108] sm:$0xff] }
  0x33   : > { %2067 = vmatprep.subr.bf16.mxu0 %v2066_v18 }
  0x34   : > { %2065 = vmatpush3.bf16.msra.mxu1 %v2062_v15  ;;  %v398_v15 = vld [vmem:[#allocation2 + $0xe8] sm:$0xff] }
  0x35   : > { %1863 = vmatmul.mubr.msk.f32.vlgmr.msra.gmra.mrb[0].mxu0 %vm185_vm0, %v163_v10  ;;  %v395_v10 = vld [vmem:[#allocation2 + $0xd0] sm:$0xff]  ;;  %v2078_v16 = vpack.c.bf16 %v398_v15, %v397_v14 }
  0x36   : > { %1865 = vmatprep.mubr.msk.f32.mxu0 %vm185_vm0, %v164_v11  ;;  %2069 = vmatpush3.bf16.msra.mxu0 %v2066_v18  ;;  %v2070_v11 = vpack.c.bf16 %v394_v9, %v393_v8  ;;  %v400_v18 = vld [vmem:[#allocation2 + $0xf8] sm:$0xff] }
  0x37   : > { %v2082_v19 = vpack.c.bf16 %v400_v18, %v399_v17 }
  0x38   : > { %2071 = vmatprep.subr.bf16.mxu1 %v2070_v11 }
  0x39   : > { %1866 = vmatmul.mubr.msk.f32.gmra.mrb[2].mxu0 %vm185_vm0, %v165_v12  ;;  %v396_v12 = vld [vmem:[#allocation2 + $0xd8] sm:$0xff] }
  0x3a   : > { %v2074_v13 = vpack.c.bf16 %v396_v12, %v395_v10 }
 0x108   : > { %v1864_v24 = vpop.f32.mrb[0].mxu0 }
 0x109   : > { %v270_v25 = vadd.f32 %v1864_v24, %v184_v23  ;;  %v264_v26 = vpop.f32.mrb[1].mxu0  ;;  %v403_v24 = vld [vmem:[#allocation2 + $0x110] sm:$0xff] }
 0x10a   : > { %v265_v27 = vadd.f32 %v264_v26, %v184_v23 }
 0x10b   : > { %v284_v30 = vmax.f32 %v270_v25, 0.0  ;;  %v404_v25 = vld [vmem:[#allocation2 + $0x118] sm:$0xff] }
 0x10c   : > { %v283_v28 = vmax.f32 %v265_v27, 0.0  ;;  %v1867_v29 = vpop.f32.mrb[2].mxu0  ;;  %v2090_v26 = vpack.c.bf16 %v404_v25, %v403_v24 }
 0x10d   : > { %v280_v31 = vadd.f32 %v1867_v29, %v184_v23  ;;  %v274_v32 = vpop.f32.mrb[3].mxu0 }
 0x10e   : > { %v275_v33 = vadd.f32 %v274_v32, %v184_v23  ;;  %1876 = vmatprep.mubr.msk.f32.mxu1 %vm185_vm0, %v283_v28  ;;  %v2086_v23 = vpack.c.bf16 %v402_v22, %v401_v21 }
 0x10f   : > { %v286_v34 = vmax.f32 %v280_v31, 0.0  ;;  %1877 = vmatmul.mubr.msk.f32.vlgmr.msra.gmra.mrb[0].mxu1 %vm185_vm0, %v284_v30 }
 0x110   : > { %v285_v35 = vmax.f32 %v275_v33, 0.0  ;;  %2073 = vmatpush3.bf16.msra.mxu1 %v2070_v11 }
 0x111   : > { %2075 = vmatprep.subr.bf16.mxu1 %v2074_v13 }
 0x112   : > { %1879 = vmatprep.mubr.msk.f32.mxu1 %vm185_vm0, %v285_v35 }
 0x113   : > { %1880 = vmatmul.mubr.msk.f32.gmra.mrb[2].mxu1 %vm185_vm0, %v286_v34 }
 0x114   : > { %2077 = vmatpush3.bf16.msra.mxu1 %v2074_v13 }
 0x115   : > { %2079 = vmatprep.subr.bf16.mxu1 %v2078_v16 }
 0x118   : > { %2081 = vmatpush3.bf16.msra.mxu1 %v2078_v16 }
 0x119   : > { %2083 = vmatprep.subr.bf16.mxu1 %v2082_v19 }
 0x11c   : > { %2085 = vmatpush3.bf16.msra.mxu1 %v2082_v19 }
 0x11d   : > { %2087 = vmatprep.subr.bf16.mxu1 %v2086_v23 }
 0x120   : > { %2089 = vmatpush3.bf16.msra.mxu1 %v2086_v23 }
 0x121   : > { %2091 = vmatprep.subr.bf16.mxu1 %v2090_v26 }
 0x124   : > { %2093 = vmatpush3.bf16.msra.mxu1 %v2090_v26 }
 0x1e2   : > { %v1878_v38 = vpop.f32.mrb[0].mxu1 }
 0x1e3   : > { %v369_v39 = vpop.f32.mrb[1].mxu1  ;;  %v2352_v41 = vadd.f32 %v1878_v38, %v290_v37 }
 0x1e4   : > { %v2350_v40 = vadd.f32 %v369_v39, %v290_v37 }
 0x1e6   : > { %v1881_v42 = vpop.f32.mrb[2].mxu1  ;;  %1886 = vmatprep.mubr.msk.f32.mxu0 %vm413_vm1, %v2350_v40 }
 0x1e7   : > { %v2356_v43 = vadd.f32 %v1881_v42, %v290_v37  ;;  %v379_v44 = vpop.f32.mrb[3].mxu1  ;;  %1887 = vmatmul.mubr.msk.f32.vlgmr.msra.gmra.mrb[4].mxu0 %vm413_vm1, %v2352_v41 }
 0x1e8   : > { %v2360_v45 = vadd.f32 %v379_v44, %v290_v37 }
 0x1ea   : > { %1889 = vmatprep.mubr.msk.f32.mxu0 %vm413_vm1, %v2360_v45 }
 0x1eb   : > { %1890 = vmatmul.mubr.msk.f32.gmra.mrb[6].mxu0 %vm413_vm1, %v2356_v43 }
 0x2ba   : > { %v1888_v47 = vpop.f32.mrb[4].mxu0 }
 0x2bb   : > { %v492_v48 = vpop.f32.mrb[5].mxu0  ;;  %v498_v52 = vadd.f32 %v1888_v47, %v1697_v46  ;;  %v405_v47 = vld [vmem:[#allocation2 + $0x120] sm:$0xff] }
 0x2bc   : > { %v493_v49 = vadd.f32 %v1697_v46, %v492_v48  ;;  %v406_v48 = vld [vmem:[#allocation2 + $0x128] sm:$0xff] }
 0x2be   : > { %v1891_v50 = vpop.f32.mrb[6].mxu0  ;;  %511 = vmin.xlane.f32.xlu0 %v493_v49 }
 0x2bf   : > { %v502_v51 = vpop.f32.mrb[7].mxu0  ;;  %v508_v54 = vadd.f32 %v1891_v50, %v1697_v46  ;;  %v407_v50 = vld [vmem:[#allocation2 + $0x130] sm:$0xff] }
 0x2c0   : > { %v503_v53 = vadd.f32 %v1697_v46, %v502_v51  ;;  %v408_v51 = vld [vmem:[#allocation2 + $0x138] sm:$0xff] }
 0x2c2   : > { %515 = vmin.xlane.f32.xlu1 %v503_v53  ;;  %513 = vmin.xlane.f32.xlu0 %v498_v52 }
 0x2c6   : > { %517 = vmin.xlane.f32.xlu1 %v508_v54 }
 0x34b   : > { %v512_v56 = vpop.xlane.xlu0 %511 }
 0x34c   : > { %vm519_vm2 = vcmp.le.f32.partialorder %v493_v49, %v512_v56  ;;  %v2094_v49 = vpack.c.bf16 %v406_v48, %v405_v47  ;;  %v703_v48 = vld [vmem:[#allocation2 + $0x140] sm:$0xff] }
 0x34d   : > { %v523_v57 = vsel %vm519_vm2, %v2366_v55, 128 }
 0x34e   : > { %v528_v58 = vshra.s32 %v523_v57, 16  ;;  %v527_v27 = vand.u32 65535, %v523_v57  ;;  %2095 = vmatprep.subr.bf16.mxu1 %v2094_v49 }
 0x34f   : > { %v516_v59 = vpop.xlane.xlu1 %515  ;;  %v514_v60 = vpop.xlane.xlu0 %513  ;;  %2097 = vmatpush3.bf16.msra.mxu1 %v2094_v49  ;;  %v704_v49 = vld [vmem:[#allocation2 + $0x148] sm:$0xff] }
 0x350   : > { %vm521_vm3 = vcmp.le.f32.partialorder %v503_v53, %v516_v59  ;;  %vm520_vm4 = vcmp.le.f32.partialorder %v498_v52, %v514_v60  ;;  %v530_v61 = vcvt.s32.f32 %v528_v58  ;;  %v529_v31 = vcvt.s32.f32 %v527_v27  ;;  %v700_v53 = vld [vmem:[#allocation2 + $0x90] sm:$0xff] }
 0x351   : > { %v525_v62 = vsel %vm521_vm3, %v2366_v55, 128  ;;  %v524_v63 = vsel %vm520_vm4, %v2366_v55, 128  ;;  %v2098_v52 = vpack.c.bf16 %v408_v51, %v407_v50  ;;  %v705_v50 = vld [vmem:[#allocation2 + $0x150] sm:$0xff]  ;;  %v2106_v51 = vpack.c.bf16 %v704_v49, %v703_v48 }
 0x352   : > { %531 = vmin.xlane.f32.xlu0 %v530_v61  ;;  %v556_v0 = vshra.s32 %v525_v62, 16  ;;  %v542_v1 = vshra.s32 %v524_v63, 16  ;;  %v555_v28 = vand.u32 65535, %v525_v62  ;;  %v541_v29 = vand.u32 65535, %v524_v63 }
 0x353   : > { %v518_v2 = vpop.xlane.xlu1 %517  ;;  %2099 = vmatprep.subr.bf16.mxu1 %v2098_v52 }
 0x354   : > { %vm522_vm5 = vcmp.le.f32.partialorder %v508_v54, %v518_v2  ;;  %v558_v3 = vcvt.s32.f32 %v556_v0  ;;  %v544_v4 = vcvt.s32.f32 %v542_v1  ;;  %v543_v36 = vcvt.s32.f32 %v541_v29  ;;  %2101 = vmatpush3.bf16.msra.mxu1 %v2098_v52  ;;  %v701_v54 = vld [vmem:[#allocation2 + $0x98] sm:$0xff] }
 0x355   : > { %v526_v5 = vsel %vm522_vm5, %v2366_v55, 128  ;;  %v557_v37 = vcvt.s32.f32 %v555_v28  ;;  %v2102_v56 = vpack.c.bf16 %v701_v54, %v700_v53  ;;  %v706_v52 = vld [vmem:[#allocation2 + $0x158] sm:$0xff]  ;;  %v707_v54 = vld [vmem:[#allocation2 + $0x160] sm:$0xff] }
 0x356   : > { %559 = vmin.xlane.f32.xlu0 %v558_v3  ;;  %545 = vmin.xlane.f32.xlu1 %v544_v4  ;;  %v570_v6 = vshra.s32 %v526_v5, 16  ;;  %v569_v33 = vand.u32 65535, %v526_v5  ;;  %v2110_v53 = vpack.c.bf16 %v706_v52, %v705_v50 }
 0x357   : > { %2103 = vmatprep.subr.bf16.mxu0 %v2102_v56 }
 0x358   : > { %v572_v7 = vcvt.s32.f32 %v570_v6  ;;  %v571_v44 = vcvt.s32.f32 %v569_v33  ;;  %2105 = vmatpush3.bf16.msra.mxu0 %v2102_v56  ;;  %v708_v56 = vld [vmem:[#allocation2 + $0x168] sm:$0xff] }
 0x359   : > { %2107 = vmatprep.subr.bf16.mxu0 %v2106_v51 }
 0x35a   : > { %573 = vmin.xlane.f32.xlu1 %v572_v7 }
 0x3df   : > { %v532_v30 = vpop.xlane.xlu0 %531 }
 0x3e0   : > { %vm533_vm6 = vcmp.eq.f32.partialorder %v530_v61, %v532_v30  ;;  %v538_v57 = vcvt.f32.s32 %v532_v30 }
 0x3e1   : > { %v534_v32 = vsel %vm533_vm6, %v529_v31, inf }
 0x3e2   : > { %535 = vmin.xlane.f32.xlu0 %v534_v32  ;;  %v539_v61 = vshll.u32 %v538_v57, 16  ;;  %v2114_v57 = vpack.c.bf16 %v708_v56, %v707_v54 }
 0x3e3   : > { %v546_v34 = vpop.xlane.xlu1 %545  ;;  %v560_v35 = vpop.xlane.xlu0 %559 }
 0x3e4   : > { %vm547_vm7 = vcmp.eq.f32.partialorder %v544_v4, %v546_v34  ;;  %vm561_vm8 = vcmp.eq.f32.partialorder %v558_v3, %v560_v35  ;;  %v552_v58 = vcvt.f32.s32 %v546_v34  ;;  %v566_v59 = vcvt.f32.s32 %v560_v35 }
 0x3e5   : > { %v548_v38 = vsel %vm547_vm7, %v543_v36, inf  ;;  %v562_v39 = vsel %vm561_vm8, %v557_v37, inf }
 0x3e6   : > { %549 = vmin.xlane.f32.xlu1 %v548_v38  ;;  %563 = vmin.xlane.f32.xlu0 %v562_v39  ;;  %v553_v0 = vshll.u32 %v552_v58, 16  ;;  %v567_v1 = vshll.u32 %v566_v59, 16  ;;  %v709_v58 = vld [vmem:[#allocation2 + $0x170] sm:$0xff]  ;;  %v710_v59 = vld [vmem:[#allocation2 + $0x178] sm:$0xff] }
 0x3e7   : > { %v574_v42 = vpop.xlane.xlu1 %573 }
 0x3e8   : > { %vm575_vm9 = vcmp.eq.f32.partialorder %v572_v7, %v574_v42  ;;  %v580_v4 = vcvt.f32.s32 %v574_v42  ;;  %v2257_v7 = vmov 1.0  }
 0x3e9   : > { %v576_v46 = vsel %vm575_vm9, %v571_v44, inf }
 0x3ea   : > { %577 = vmin.xlane.f32.xlu1 %v576_v46  ;;  %v581_v11 = vshll.u32 %v580_v4, 16  ;;  %v715_v4 = vld [vmem:[#allocation2 + $0x1a0] sm:$0xff] }
 0x46f   : > { %v536_v60 = vpop.xlane.xlu0 %535 }
 0x470   : > { %v537_v62 = vcvt.f32.s32 %v536_v60  ;;  %v2118_v60 = vpack.c.bf16 %v710_v59, %v709_v58 }
 0x472   : > { %v2372_v63 = vadd.s32 %v539_v61, %v537_v62  ;;  %v711_v61 = vld [vmem:[#allocation2 + $0x180] sm:$0xff]  ;;  %v712_v62 = vld [vmem:[#allocation2 + $0x188] sm:$0xff] }
 0x473   : > { %v550_v2 = vpop.xlane.xlu1 %549  ;;  %v564_v3 = vpop.xlane.xlu0 %563 }
 0x474   : > { %v551_v5 = vcvt.f32.s32 %v550_v2  ;;  %v565_v6 = vcvt.f32.s32 %v564_v3  ;;  %vm587_vm10 = vcmp.eq.s32.totalorder %v2366_v55, %v2372_v63  ;;  %v714_v2 = vld [vmem:[#allocation2 + $0x198] sm:$0xff] }
 0x475   : > { %1924 = vmatprep.mubr.msk.f32.mxu1 %vm587_vm10, %v2257_v7 }
 0x476   : > { %v2377_v8 = vadd.s32 %v553_v0, %v551_v5  ;;  %v2379_v9 = vadd.s32 %v567_v1, %v565_v6  ;;  %v2122_v0 = vpack.c.bf16 %v712_v62, %v711_v61  ;;  %v713_v1 = vld [vmem:[#allocation2 + $0x190] sm:$0xff]  ;;  %v716_v5 = vld [vmem:[#allocation2 + $0x1a8] sm:$0xff] }
 0x477   : > { %v578_v10 = vpop.xlane.xlu1 %577  ;;  %v2126_v3 = vpack.c.bf16 %v714_v2, %v713_v1  ;;  %v2130_v6 = vpack.c.bf16 %v716_v5, %v715_v4 }
 0x478   : > { %vm588_vm11 = vcmp.eq.s32.totalorder %v2366_v55, %v2377_v8  ;;  %v579_v12 = vcvt.f32.s32 %v578_v10  ;;  %vm589_vm12 = vcmp.eq.s32.totalorder %v2366_v55, %v2379_v9 }
 0x479   : > { %1925 = vmatmul.mubr.msk.f32.vlgmr.msra.gmra.mrb[4].mxu1 %vm588_vm11, %v2257_v7 }
 0x47a   : > { %v2386_v13 = vadd.s32 %v581_v11, %v579_v12  ;;  %1927 = vmatprep.mubr.msk.f32.mxu1 %vm589_vm12, %v2257_v7 }
 0x47c   : > { %vm590_vm13 = vcmp.eq.s32.totalorder %v2366_v55, %v2386_v13 }
 0x47d   : > { %1928 = vmatmul.mubr.msk.f32.gmra.mrb[6].mxu1 %vm590_vm13, %v2257_v7 }
 0x54c   : > { %v2392_v14 = vpop.f32.mrb[4].mxu1 }
 0x54d   : > { %v2394_v15 = vpop.f32.mrb[5].mxu1  ;;  %v2402_v17 = vsub.f32 %v2352_v41, %v2392_v14  ;;  %v1710_v41 = vld [vmem:[#allocation2 + $0xa0] ss:$0 sm:$0xff] }
 0x54e   : > { %v2398_v16 = vsub.f32 %v2350_v40, %v2394_v15 }
 0x550   : > { %v2404_v18 = vpop.f32.mrb[6].mxu1  ;;  %1934 = vmatprep.mubr.msk.f32.mxu0 %vm413_vm1, %v2398_v16 }
 0x551   : > { %v2408_v19 = vpop.f32.mrb[7].mxu1  ;;  %1935 = vmatmul.mubr.msk.f32.vlgmr.msra.gmra.mrb[8].mxu0 %vm413_vm1, %v2402_v17  ;;  %v2418_v40 = vsub.f32 %v2356_v43, %v2404_v18 }
 0x552   : > { %v2414_v21 = vsub.f32 %v2360_v45, %v2408_v19  ;;  %2109 = vmatpush3.bf16.msra.mxu0 %v2106_v51 }
 0x553   : > { %2111 = vmatprep.subr.bf16.mxu0 %v2110_v53 }
 0x554   : > { %1937 = vmatprep.mubr.msk.f32.mxu0 %vm413_vm1, %v2414_v21 }
 0x555   : > { %1938 = vmatmul.mubr.msk.f32.gmra.mrb[10].mxu0 %vm413_vm1, %v2418_v40 }
 0x556   : > { %2113 = vmatpush3.bf16.msra.mxu0 %v2110_v53 }
 0x557   : > { %2115 = vmatprep.subr.bf16.mxu0 %v2114_v57 }
 0x55a   : > { %2117 = vmatpush3.bf16.msra.mxu0 %v2114_v57 }
 0x55b   : > { %2119 = vmatprep.subr.bf16.mxu0 %v2118_v60 }
 0x55e   : > { %2121 = vmatpush3.bf16.msra.mxu0 %v2118_v60 }
 0x55f   : > { %2123 = vmatprep.subr.bf16.mxu0 %v2122_v0 }
 0x562   : > { %2125 = vmatpush3.bf16.msra.mxu0 %v2122_v0 }
 0x563   : > { %2127 = vmatprep.subr.bf16.mxu0 %v2126_v3 }
 0x566   : > { %2129 = vmatpush3.bf16.msra.mxu0 %v2126_v3 }
 0x567   : > { %2131 = vmatprep.subr.bf16.mxu0 %v2130_v6 }
 0x56a   : > { %2133 = vmatpush3.bf16.msra.mxu0 %v2130_v6 }
 0x624   : > { %v1936_v22 = vpop.f32.mrb[8].mxu0 }
 0x625   : > { %v807_v23 = vadd.f32 %v1936_v22, %v1710_v41  ;;  %v801_v24 = vpop.f32.mrb[9].mxu0 }
 0x626   : > { %v802_v25 = vadd.f32 %v1710_v41, %v801_v24 }
 0x627   : > { %822 = vmin.xlane.f32.xlu1 %v807_v23 }
 0x628   : > { %820 = vmin.xlane.f32.xlu0 %v802_v25  ;;  %v1939_v26 = vpop.f32.mrb[10].mxu0 }
 0x629   : > { %v817_v45 = vadd.f32 %v1939_v26, %v1710_v41  ;;  %v811_v27 = vpop.f32.mrb[11].mxu0 }
 0x62a   : > { %v812_v28 = vadd.f32 %v1710_v41, %v811_v27 }
 0x62b   : > { %826 = vmin.xlane.f32.xlu1 %v817_v45 }
 0x62c   : > { %824 = vmin.xlane.f32.xlu0 %v812_v28 }
 0x6b4   : > { %v823_v43 = vpop.xlane.xlu1 %822 }
 0x6b5   : > { %vm829_vm14 = vcmp.le.f32.partialorder %v807_v23, %v823_v43  ;;  %v821_v29 = vpop.xlane.xlu0 %820 }
 0x6b6   : > { %v833_v30 = vsel %vm829_vm14, %v2366_v55, 128  ;;  %vm828_vm15 = vcmp.le.f32.partialorder %v802_v25, %v821_v29 }
 0x6b7   : > { %v832_v31 = vsel %vm828_vm15, %v2366_v55, 128  ;;  %v851_v32 = vshra.s32 %v833_v30, 16  ;;  %v850_v10 = vand.u32 65535, %v833_v30 }
 0x6b8   : > { %v827_v33 = vpop.xlane.xlu1 %826  ;;  %v837_v34 = vshra.s32 %v832_v31, 16  ;;  %v836_v11 = vand.u32 65535, %v832_v31  ;;  %v717_v31 = vld [vmem:[#allocation2 + $0x1b0] sm:$0xff] }
 0x6b9   : > { %vm831_vm2 = vcmp.le.f32.partialorder %v817_v45, %v827_v33  ;;  %v825_v35 = vpop.xlane.xlu0 %824  ;;  %v853_v36 = vcvt.s32.f32 %v851_v32  ;;  %v852_v22 = vcvt.s32.f32 %v850_v10  ;;  %v718_v33 = vld [vmem:[#allocation2 + $0x1b8] sm:$0xff] }
 0x6ba   : > { %v835_v37 = vsel %vm831_vm2, %v2366_v55, 128  ;;  %vm830_vm3 = vcmp.le.f32.partialorder %v812_v28, %v825_v35  ;;  %v839_v38 = vcvt.s32.f32 %v837_v34  ;;  %v838_v25 = vcvt.s32.f32 %v836_v11  ;;  %v1009_v35 = vld [vmem:[#allocation2 + $0xa8] sm:$0xff] }
 0x6bb   : > { %v834_v39 = vsel %vm830_vm3, %v2366_v55, 128  ;;  %854 = vmin.xlane.f32.xlu1 %v853_v36  ;;  %v879_v42 = vshra.s32 %v835_v37, 16  ;;  %v878_v12 = vand.u32 65535, %v835_v37  ;;  %v2134_v34 = vpack.c.bf16 %v718_v33, %v717_v31 }
 0x6bc   : > { %840 = vmin.xlane.f32.xlu0 %v839_v38  ;;  %v865_v44 = vshra.s32 %v834_v39, 16  ;;  %v864_v23 = vand.u32 65535, %v834_v39 }
 0x6bd   : > { %v881_v46 = vcvt.s32.f32 %v879_v42  ;;  %v880_v28 = vcvt.s32.f32 %v878_v12  ;;  %2135 = vmatprep.subr.bf16.mxu0 %v2134_v34 }
 0x6be   : > { %v867_v47 = vcvt.s32.f32 %v865_v44  ;;  %v866_v29 = vcvt.s32.f32 %v864_v23  ;;  %2137 = vmatpush3.bf16.msra.mxu0 %v2134_v34 }
 0x6bf   : > { %882 = vmin.xlane.f32.xlu1 %v881_v46 }
 0x6c0   : > { %868 = vmin.xlane.f32.xlu0 %v867_v47 }
 0x748   : > { %v855_v41 = vpop.xlane.xlu1 %854 }
 0x749   : > { %v841_v24 = vpop.xlane.xlu0 %840  ;;  %vm856_vm4 = vcmp.eq.f32.partialorder %v853_v36, %v855_v41  ;;  %v1010_v36 = vld [vmem:[#allocation2 + $0xb0] sm:$0xff] }
 0x74a   : > { %v857_v26 = vsel %vm856_vm4, %v852_v22, inf  ;;  %vm842_vm5 = vcmp.eq.f32.partialorder %v839_v38, %v841_v24  ;;  %v2138_v37 = vpack.c.bf16 %v1010_v36, %v1009_v35  ;;  %v861_v38 = vcvt.f32.s32 %v855_v41 }
 0x74b   : > { %858 = vmin.xlane.f32.xlu1 %v857_v26  ;;  %v843_v45 = vsel %vm842_vm5, %v838_v25, inf  ;;  %v847_v39 = vcvt.f32.s32 %v841_v24 }
 0x74c   : > { %v883_v27 = vpop.xlane.xlu1 %882  ;;  %844 = vmin.xlane.f32.xlu0 %v843_v45  ;;  %2139 = vmatprep.subr.bf16.mxu1 %v2138_v37  ;;  %v862_v44 = vshll.u32 %v861_v38, 16 }
 0x74d   : > { %v869_v43 = vpop.xlane.xlu0 %868  ;;  %vm884_vm6 = vcmp.eq.f32.partialorder %v881_v46, %v883_v27  ;;  %2141 = vmatpush3.bf16.msra.mxu1 %v2138_v37  ;;  %v889_v46 = vcvt.f32.s32 %v883_v27  ;;  %v848_v49 = vshll.u32 %v847_v39, 16 }
 0x74e   : > { %v885_v32 = vsel %vm884_vm6, %v880_v28, inf  ;;  %vm870_vm7 = vcmp.eq.f32.partialorder %v867_v47, %v869_v43  ;;  %v875_v50 = vcvt.f32.s32 %v869_v43 }
 0x74f   : > { %886 = vmin.xlane.f32.xlu1 %v885_v32  ;;  %v871_v30 = vsel %vm870_vm7, %v866_v29, inf  ;;  %v890_v56 = vshll.u32 %v889_v46, 16  ;;  %v1012_v46 = vld [vmem:[#allocation2 + $0x1c0] sm:$0xff] }
 0x750   : > { %872 = vmin.xlane.f32.xlu0 %v871_v30  ;;  %v876_v59 = vshll.u32 %v875_v50, 16  ;;  %v1015_v50 = vld [vmem:[#allocation2 + $0x1d8] sm:$0xff] }
 0x7d8   : > { %v859_v42 = vpop.xlane.xlu1 %858 }
 0x7d9   : > { %v860_v48 = vcvt.f32.s32 %v859_v42  ;;  %v845_v47 = vpop.xlane.xlu0 %844 }
 0x7da   : > { %v846_v51 = vcvt.f32.s32 %v845_v47  ;;  %v1014_v47 = vld [vmem:[#allocation2 + $0x1d0] sm:$0xff] }
 0x7db   : > { %v2428_v52 = vadd.s32 %v862_v44, %v860_v48  ;;  %v1013_v48 = vld [vmem:[#allocation2 + $0x1c8] sm:$0xff] }
 0x7dc   : > { %v2430_v53 = vadd.s32 %v848_v49, %v846_v51  ;;  %v887_v54 = vpop.xlane.xlu1 %886  ;;  %v2142_v49 = vpack.c.bf16 %v1013_v48, %v1012_v46  ;;  %v2146_v51 = vpack.c.bf16 %v1015_v50, %v1014_v47 }
 0x7dd   : > { %v888_v57 = vcvt.f32.s32 %v887_v54  ;;  %v873_v58 = vpop.xlane.xlu0 %872  ;;  %vm897_vm9 = vcmp.eq.s32.totalorder %v2366_v55, %v2428_v52  ;;  %v1016_v54 = vld [vmem:[#allocation2 + $0x1e0] sm:$0xff] }
 0x7de   : > { %v874_v60 = vcvt.f32.s32 %v873_v58  ;;  %vm896_vm8 = vcmp.eq.s32.totalorder %v2366_v55, %v2430_v53  ;;  %2143 = vmatprep.subr.bf16.mxu1 %v2142_v49  ;;  %v1018_v58 = vld [vmem:[#allocation2 + $0x1f0] sm:$0xff] }
 0x7df   : > { %v2436_v61 = vadd.s32 %v890_v56, %v888_v57  ;;  %1972 = vmatprep.mubr.msk.f32.mxu0 %vm896_vm8, %v2257_v7  ;;  %v1017_v56 = vld [vmem:[#allocation2 + $0x1e8] sm:$0xff] }
 0x7e0   : > { %v2439_v62 = vadd.s32 %v876_v59, %v874_v60  ;;  %1973 = vmatmul.mubr.msk.f32.vlgmr.msra.gmra.mrb[12].mxu0 %vm897_vm9, %v2257_v7  ;;  %v2150_v57 = vpack.c.bf16 %v1017_v56, %v1016_v54  ;;  %v1019_v59 = vld [vmem:[#allocation2 + $0x1f8] sm:$0xff] }
 0x7e1   : > { %vm899_vm11 = vcmp.eq.s32.totalorder %v2366_v55, %v2436_v61  ;;  %v2154_v60 = vpack.c.bf16 %v1019_v59, %v1018_v58 }
 0x7e2   : > { %vm898_vm10 = vcmp.eq.s32.totalorder %v2366_v55, %v2439_v62 }
 0x7e3   : > { %1975 = vmatprep.mubr.msk.f32.mxu0 %vm898_vm10, %v2257_v7  ;;  %vm1576_vm10 = vcmask 392192  }
 0x7e4   : > { %1976 = vmatmul.mubr.msk.f32.gmra.mrb[14].mxu0 %vm899_vm11, %v2257_v7  ;;  %vm1581_vm11 = vcmask 400384  }
 0x8b3   : > { %v1974_v0 = vpop.f32.mrb[12].mxu0 }
 0x8b4   : > { %v2449_v1 = vadd.f32 %v1974_v0, %v2392_v14  ;;  %v974_v2 = vpop.f32.mrb[13].mxu0  ;;  %v2458_v5 = vsub.f32 %v2402_v17, %v1974_v0  ;;  %v1020_v0 = vld [vmem:[#allocation2 + $0x200] sm:$0xff] }
 0x8b5   : > { %v2452_v3 = vsub.f32 %v2398_v16, %v974_v2  ;;  %v2455_v4 = vadd.f32 %v974_v2, %v2394_v15  ;;  %v1021_v2 = vld [vmem:[#allocation2 + $0x208] sm:$0xff] }
 0x8b7   : > { %v1977_v6 = vpop.f32.mrb[14].mxu0  ;;  %1982 = vmatprep.mubr.msk.f32.mxu1 %vm413_vm1, %v2452_v3 }
 0x8b8   : > { %v2463_v10 = vadd.f32 %v1977_v6, %v2404_v18  ;;  %v984_v11 = vpop.f32.mrb[15].mxu0  ;;  %1983 = vmatmul.mubr.msk.f32.vlgmr.msra.gmra.mrb[8].mxu1 %vm413_vm1, %v2458_v5  ;;  %v2474_v12 = vsub.f32 %v2418_v40, %v1977_v6  ;;  %v1723_v18 = vld [vmem:[#allocation2 + $0xb8] ss:$0 sm:$0xff]  ;;  %v2158_v6 = vpack.c.bf16 %v1021_v2, %v1020_v0 }
 0x8b9   : > { %v2468_v14 = vsub.f32 %v2414_v21, %v984_v11  ;;  %v2471_v15 = vadd.f32 %v984_v11, %v2408_v19  ;;  %2145 = vmatpush3.bf16.msra.mxu1 %v2142_v49  ;;  %v1022_v11 = vld [vmem:[#allocation2 + $0x210] sm:$0xff] }
 0x8ba   : > { %2147 = vmatprep.subr.bf16.mxu1 %v2146_v51 }
 0x8bb   : > { %1985 = vmatprep.mubr.msk.f32.mxu1 %vm413_vm1, %v2468_v14 }
 0x8bc   : > { %1986 = vmatmul.mubr.msk.f32.gmra.mrb[10].mxu1 %vm413_vm1, %v2474_v12 }
 0x8bd   : > { %2149 = vmatpush3.bf16.msra.mxu1 %v2146_v51 }
 0x8be   : > { %2151 = vmatprep.subr.bf16.mxu1 %v2150_v57 }
 0x8c1   : > { %2153 = vmatpush3.bf16.msra.mxu1 %v2150_v57 }
 0x8c2   : > { %2155 = vmatprep.subr.bf16.mxu1 %v2154_v60 }
 0x8c5   : > { %2157 = vmatpush3.bf16.msra.mxu1 %v2154_v60 }
 0x8c6   : > { %2159 = vmatprep.subr.bf16.mxu1 %v2158_v6 }
 0x8c9   : > { %2161 = vmatpush3.bf16.msra.mxu1 %v2158_v6 }
 0x98b   : > { %v1984_v41 = vpop.f32.mrb[8].mxu1 }
 0x98c   : > { %v1116_v22 = vadd.f32 %v1984_v41, %v1723_v18  ;;  %v1110_v23 = vpop.f32.mrb[9].mxu1 }
 0x98d   : > { %v1111_v24 = vadd.f32 %v1723_v18, %v1110_v23  ;;  %v1025_v23 = vld [vmem:[#allocation2 + $0x228] sm:$0xff] }
 0x98e   : > { %1131 = vmin.xlane.f32.xlu1 %v1116_v22 }
 0x98f   : > { %1129 = vmin.xlane.f32.xlu0 %v1111_v24  ;;  %v1987_v25 = vpop.f32.mrb[10].mxu1 }
 0x990   : > { %v1126_v26 = vadd.f32 %v1987_v25, %v1723_v18  ;;  %v1120_v19 = vpop.f32.mrb[11].mxu1 }
 0x991   : > { %v1121_v45 = vadd.f32 %v1723_v18, %v1120_v19  ;;  %v1023_v18 = vld [vmem:[#allocation2 + $0x218] sm:$0xff] }
 0x992   : > { %1135 = vmin.xlane.f32.xlu1 %v1126_v26  ;;  %v2162_v41 = vpack.c.bf16 %v1023_v18, %v1022_v11 }
 0x993   : > { %1133 = vmin.xlane.f32.xlu0 %v1121_v45 }
 0x994   : > { %2163 = vmatprep.subr.bf16.mxu1 %v2162_v41 }
 0x995   : > { %2165 = vmatpush3.bf16.msra.mxu1 %v2162_v41 }
 0xa1b   : > { %v1132_v27 = vpop.xlane.xlu1 %1131 }
 0xa1c   : > { %vm1138_vm12 = vcmp.le.f32.partialorder %v1116_v22, %v1132_v27  ;;  %v1130_v28 = vpop.xlane.xlu0 %1129  ;;  %v1024_v22 = vld [vmem:[#allocation2 + $0x220] sm:$0xff] }
 0xa1d   : > { %v1142_v43 = vsel %vm1138_vm12, %v2366_v55, 128  ;;  %vm1137_vm13 = vcmp.le.f32.partialorder %v1111_v24, %v1130_v28  ;;  %v2166_v24 = vpack.c.bf16 %v1025_v23, %v1024_v22  ;;  %vm1591_vm12 = vcmask 416768  }
 0xa1e   : > { %v1141_v29 = vsel %vm1137_vm13, %v2366_v55, 128  ;;  %v1160_v32 = vshra.s32 %v1142_v43, 16  ;;  %v1159_v25 = vand.u32 65535, %v1142_v43  ;;  %vm1596_vm13 = vcmask 424960  }
 0xa1f   : > { %v1136_v30 = vpop.xlane.xlu1 %1135  ;;  %v1146_v31 = vshra.s32 %v1141_v29, 16  ;;  %2167 = vmatprep.subr.bf16.mxu1 %v2166_v24 }
 0xa20   : > { %vm1140_vm14 = vcmp.le.f32.partialorder %v1126_v26, %v1136_v30  ;;  %v1134_v33 = vpop.xlane.xlu0 %1133  ;;  %v1162_v34 = vcvt.s32.f32 %v1160_v32  ;;  %2169 = vmatpush3.bf16.msra.mxu1 %v2166_v24  ;;  %v1145_v26 = vand.u32 65535, %v1141_v29  ;;  %v1161_v27 = vcvt.s32.f32 %v1159_v25  ;;  %v1026_v29 = vld [vmem:[#allocation2 + $0x230] sm:$0xff] }
 0xa21   : > { %v1144_v35 = vsel %vm1140_vm14, %v2366_v55, 128  ;;  %vm1139_vm15 = vcmp.le.f32.partialorder %v1121_v45, %v1134_v33  ;;  %v1148_v36 = vcvt.s32.f32 %v1146_v31  ;;  %vm1601_vm14 = vcmask 433152  }
 0xa22   : > { %v1143_v37 = vsel %vm1139_vm15, %v2366_v55, 128  ;;  %1163 = vmin.xlane.f32.xlu1 %v1162_v34  ;;  %v1188_v38 = vshra.s32 %v1144_v35, 16  ;;  %v1187_v19 = vand.u32 65535, %v1144_v35  ;;  %v1147_v30 = vcvt.s32.f32 %v1145_v26  ;;  %v1027_v35 = vld [vmem:[#allocation2 + $0x238] sm:$0xff] }
 0xa23   : > { %1149 = vmin.xlane.f32.xlu0 %v1148_v36  ;;  %v1174_v39 = vshra.s32 %v1143_v37, 16  ;;  %v1173_v28 = vand.u32 65535, %v1143_v37  ;;  %v2170_v37 = vpack.c.bf16 %v1027_v35, %v1026_v29  ;;  %v1002_v26 = vmul.f32 %v2458_v5, %v2458_v5 }
 0xa24   : > { %v1190_v42 = vcvt.s32.f32 %v1188_v38 }
 0xa25   : > { %v1176_v44 = vcvt.s32.f32 %v1174_v39  ;;  %v1189_v39 = vcvt.s32.f32 %v1187_v19  ;;  %v1175_v48 = vcvt.s32.f32 %v1173_v28  ;;  %2171 = vmatprep.subr.bf16.mxu1 %v2170_v37  ;;  %v1001_v19 = vmul.f32 %v2452_v3, %v2452_v3 }
 0xa26   : > { %1191 = vmin.xlane.f32.xlu1 %v1190_v42  ;;  %2173 = vmatpush3.bf16.msra.mxu1 %v2170_v37 }
 0xa27   : > { %1177 = vmin.xlane.f32.xlu0 %v1176_v44 }
 0xaaf   : > { %v1164_v45 = vpop.xlane.xlu1 %1163 }
 0xab0   : > { %v1150_v32 = vpop.xlane.xlu0 %1149  ;;  %vm1165_vm2 = vcmp.eq.f32.partialorder %v1162_v34, %v1164_v45  ;;  %v174_v34 = vld [vmem:[#allocation2 + $0x40] sm:$0xff]  ;;  %v1170_v50 = vcvt.f32.s32 %v1164_v45 }
 0xab1   : > { %v1166_v31 = vsel %vm1165_vm2, %v1161_v27, inf  ;;  %vm1151_vm3 = vcmp.eq.f32.partialorder %v1148_v36, %v1150_v32  ;;  %v175_v36 = vld [vmem:[#allocation2 + $0x48] sm:$0xff]  ;;  %v1156_v51 = vcvt.f32.s32 %v1150_v32  ;;  %v693_v27 = vmul.f32 %v2402_v17, %v2402_v17 }
 0xab2   : > { %1167 = vmin.xlane.f32.xlu1 %v1166_v31  ;;  %v1152_v33 = vsel %vm1151_vm3, %v1147_v30, inf  ;;  %v2174_v49 = vpack.c.bf16 %v175_v36, %v174_v34  ;;  %v695_v17 = vmul.f32 %v2418_v40, %v2418_v40  ;;  %v694_v40 = vmul.f32 %v2414_v21, %v2414_v21 }
 0xab3   : > { %v1192_v38 = vpop.xlane.xlu1 %1191  ;;  %1153 = vmin.xlane.f32.xlu0 %v1152_v33  ;;  %v1157_v58 = vshll.u32 %v1156_v51, 16  ;;  %v1004_v33 = vmul.f32 %v2474_v12, %v2474_v12  ;;  %v176_v51 = vld [vmem:[#allocation2 + $0x50] sm:$0xff] }
 0xab4   : > { %v1178_v46 = vpop.xlane.xlu0 %1177  ;;  %vm1193_vm4 = vcmp.eq.f32.partialorder %v1190_v42, %v1192_v38  ;;  %2175 = vmatprep.subr.bf16.mxu0 %v2174_v49  ;;  %v1171_v42 = vshll.u32 %v1170_v50, 16  ;;  %v1198_v56 = vcvt.f32.s32 %v1192_v38 }
 0xab5   : > { %v1194_v47 = vsel %vm1193_vm4, %v1189_v39, inf  ;;  %vm1179_vm5 = vcmp.eq.f32.partialorder %v1176_v44, %v1178_v46  ;;  %2177 = vmatpush3.bf16.msra.mxu0 %v2174_v49  ;;  %v1184_v59 = vcvt.f32.s32 %v1178_v46  ;;  %v1006_v39 = vadd.f32 %v1002_v26, %v693_v27 }
 0xab6   : > { %1195 = vmin.xlane.f32.xlu1 %v1194_v47  ;;  %v1180_v43 = vsel %vm1179_vm5, %v1175_v48, inf  ;;  %v1199_v11 = vshll.u32 %v1198_v56, 16  ;;  %v1008_v34 = vadd.f32 %v1004_v33, %v695_v17  ;;  %v178_v56 = vld [vmem:[#allocation2 + $0x60] sm:$0xff] }
 0xab7   : > { %1181 = vmin.xlane.f32.xlu0 %v1180_v43  ;;  %v1185_v22 = vshll.u32 %v1184_v59, 16  ;;  %v2209_v59 = vld [vmem:[#allocation2 + $0x70] sm:$0xff] }
 0xb3f   : > { %v1168_v54 = vpop.xlane.xlu1 %1167 }
 0xb40   : > { %v1169_v57 = vcvt.f32.s32 %v1168_v54  ;;  %v1154_v44 = vpop.xlane.xlu0 %1153  ;;  %v177_v54 = vld [vmem:[#allocation2 + $0x58] sm:$0xff] }
 0xb41   : > { %v1155_v60 = vcvt.f32.s32 %v1154_v44 }
 0xb42   : > { %v2484_v0 = vadd.s32 %v1171_v42, %v1169_v57  ;;  %v2178_v42 = vpack.c.bf16 %v177_v54, %v176_v51  ;;  %v179_v57 = vld [vmem:[#allocation2 + $0x68] sm:$0xff] }
 0xb43   : > { %v2486_v2 = vadd.s32 %v1157_v58, %v1155_v60  ;;  %v1196_v6 = vpop.xlane.xlu1 %1195  ;;  %v2182_v44 = vpack.c.bf16 %v179_v57, %v178_v56  ;;  %v1320_v58 = vsub.s32 2, %v2342_v20 }
 0xb44   : > { %v1197_v18 = vcvt.f32.s32 %v1196_v6  ;;  %v1182_v41 = vpop.xlane.xlu0 %1181  ;;  %vm1206_vm7 = vcmp.eq.s32.totalorder %v2366_v55, %v2484_v0  ;;  %2179 = vmatprep.subr.bf16.mxu0 %v2178_v42 }
 0xb45   : > { %v1183_v23 = vcvt.f32.s32 %v1182_v41  ;;  %vm1205_vm6 = vcmp.eq.s32.totalorder %v2366_v55, %v2486_v2  ;;  %v1321_v60 = vrot.slane %v2209_v59, %v1320_v58  ;;  %v584_v58 = vcvt.s32.f32 %v2377_v8 }
 0xb46   : > { %v2492_v24 = vadd.s32 %v1199_v11, %v1197_v18  ;;  %2020 = vmatprep.mubr.msk.f32.mxu1 %vm1205_vm6, %v2257_v7  ;;  %v1201_v8 = vcvt.s32.f32 %v2486_v2 }
 0xb47   : > { %v2495_v25 = vadd.s32 %v1185_v22, %v1183_v23  ;;  %2021 = vmatmul.mubr.msk.f32.vlgmr.msra.gmra.mrb[12].mxu1 %vm1206_vm7, %v2257_v7 }
 0xb48   : > { %vm1208_vm9 = vcmp.eq.s32.totalorder %v2366_v55, %v2492_v24 }
 0xb49   : > { %vm1207_vm8 = vcmp.eq.s32.totalorder %v2366_v55, %v2495_v25  ;;  %v692_v55 = vmul.f32 %v2398_v16, %v2398_v16  ;;  %v1003_v16 = vmul.f32 %v2468_v14, %v2468_v14 }
 0xb4a   : > { %2023 = vmatprep.mubr.msk.f32.mxu1 %vm1207_vm8, %v2257_v7 }
 0xb4b   : > { %2024 = vmatmul.mubr.msk.f32.gmra.mrb[14].mxu1 %vm1208_vm9, %v2257_v7  ;;  %v1005_v46 = vadd.f32 %v1001_v19, %v692_v55  ;;  %v1007_v21 = vadd.f32 %v1003_v16, %v694_v40  ;;  %v1425_v55 = vsub.s32 3, %v2342_v20 }
 0xc1a   : > { %v2022_v45 = vpop.f32.mrb[12].mxu1 }
 0xc1b   : > { %v1303_v28 = vsub.f32 %v2458_v5, %v2022_v45  ;;  %v2512_v32 = vadd.f32 %v2022_v45, %v2449_v1  ;;  %v1283_v30 = vpop.f32.mrb[13].mxu1 }
 0xc1c   : > { %v1302_v7 = vsub.f32 %v2452_v3, %v1283_v30  ;;  %v2518_v31 = vadd.f32 %v1283_v30, %v2455_v4 }
 0xc1d   : > { %v1311_v38 = vmul.f32 %v1303_v28, %v1303_v28 }
 0xc1e   : > { %v1310_v5 = vmul.f32 %v1302_v7, %v1302_v7  ;;  %v2025_v1 = vpop.f32.mrb[14].mxu1  ;;  %2030 = vmatprep.mubr.msk.f32.mxu0 %vm413_vm1, %v2518_v31  ;;  %v1426_v7 = vrot.slane %v2209_v59, %v1425_v55 }
 0xc1f   : > { %v1305_v3 = vsub.f32 %v2474_v12, %v2025_v1  ;;  %v2530_v4 = vadd.f32 %v2025_v1, %v2463_v10  ;;  %v1293_v48 = vpop.f32.mrb[15].mxu1  ;;  %2031 = vmatmul.mubr.msk.f32.vlgmr.msra.gmra.mrb[16].mxu0 %vm413_vm1, %v2512_v32  ;;  %v1315_v47 = vadd.f32 %v1311_v38, %v1006_v39 }
 0xc20   : > { %v1304_v43 = vsub.f32 %v2468_v14, %v1293_v48  ;;  %v2538_v29 = vadd.f32 %v1293_v48, %v2471_v15  ;;  %v1314_v12 = vadd.f32 %v1310_v5, %v1005_v46  ;;  %2181 = vmatpush3.bf16.msra.mxu0 %v2178_v42  ;;  %v2210_v5 = vld [vmem:[%s2332_s4 + $0x8] sm:$0xff]  ;;  %v2211_v46 = vld [vmem:[%s2332_s4] sm:$0xff] }
 0xc21   : > { %v1313_v35 = vmul.f32 %v1305_v3, %v1305_v3  ;;  %v1547_v37 = vsel %vm413_vm1, %v1315_v47, 0.0  ;;  %2183 = vmatprep.subr.bf16.mxu0 %v2182_v44 }
 0xc22   : > { %v1312_v10 = vmul.f32 %v1304_v43, %v1304_v43  ;;  %1548 = vadd.xlane.f32.xlu0 %v1547_v37  ;;  %2033 = vmatprep.mubr.msk.f32.mxu0 %vm413_vm1, %v2538_v29  ;;  %v1544_v14 = vsel %vm413_vm1, %v1314_v12, 0.0  ;;  %v2212_v12 = vld [vmem:[%s2332_s4 + $0x18] sm:$0xff] }
 0xc23   : > { %2034 = vmatmul.mubr.msk.f32.gmra.mrb[18].mxu0 %vm413_vm1, %v2530_v4  ;;  %v1317_v36 = vadd.f32 %v1313_v35, %v1008_v34 }
 0xc24   : > { %v1316_v49 = vadd.f32 %v1312_v10, %v1007_v21  ;;  %2185 = vmatpush3.bf16.msra.mxu0 %v2182_v44  ;;  %v2213_v10 = vld [vmem:[%s2332_s4 + $0x10] sm:$0xff]  ;;  %v583_v44 = vcvt.s32.f32 %v2372_v63 }
 0xc25   : > { %v1553_v15 = vsel %vm413_vm1, %v1317_v36, 0.0 }
 0xc26   : > { %1545 = vadd.xlane.f32.xlu0 %v1544_v14  ;;  %1554 = vadd.xlane.f32.xlu1 %v1553_v15  ;;  %v1550_v50 = vsel %vm413_vm1, %v1316_v49, 0.0 }
 0xc2a   : > { %1551 = vadd.xlane.f32.xlu0 %v1550_v50 }
 0xcaf   : > { %v1549_v50 = vpop.xlane.xlu0 %1548 }
 0xcb3   : > { %v1546_v51 = vpop.xlane.xlu0 %1545  ;;  %v1555_v54 = vpop.xlane.xlu1 %1554 }
 0xcb7   : > { %v1552_v42 = vpop.xlane.xlu0 %1551 }
 0xcf2   : > { %v2032_v6 = vpop.f32.mrb[16].mxu0 }
 0xcf3   : > { %v1406_v11 = vadd.f32 %v2032_v6, %v1321_v60  ;;  %v1400_v18 = vpop.f32.mrb[17].mxu0  ;;  %v892_v6 = vcvt.s32.f32 %v2430_v53 }
 0xcf4   : > { %v1401_v41 = vadd.f32 %v1400_v18, %v1321_v60 }
 0xcf5   : > { %v1420_v26 = vmax.f32 %v1406_v11, 0.0 }
 0xcf6   : > { %v1419_v22 = vmax.f32 %v1401_v41, 0.0  ;;  %v2035_v23 = vpop.f32.mrb[18].mxu0  ;;  %v1202_v41 = vcvt.s32.f32 %v2484_v0 }
 0xcf7   : > { %v1416_v19 = vadd.f32 %v2035_v23, %v1321_v60  ;;  %v1410_v45 = vpop.f32.mrb[19].mxu0  ;;  %v894_v23 = vcvt.s32.f32 %v2439_v62 }
 0xcf8   : > { %v1411_v27 = vadd.f32 %v1410_v45, %v1321_v60  ;;  %2044 = vmatprep.mubr.msk.f32.mxu0 %vm185_vm0, %v1419_v22  ;;  %v893_v60 = vcvt.s32.f32 %v2428_v52 }
 0xcf9   : > { %2045 = vmatmul.mubr.msk.f32.vlgmr.msra.gmra.mrb[20].mxu0 %vm185_vm0, %v1420_v26  ;;  %v1422_v30 = vmax.f32 %v1416_v19, 0.0 }
 0xcfa   : > { %v1421_v28 = vmax.f32 %v1411_v27, 0.0 }
 0xcfc   : > { %2047 = vmatprep.mubr.msk.f32.mxu0 %vm185_vm0, %v1421_v28 }
 0xcfd   : > { %2048 = vmatmul.mubr.msk.f32.gmra.mrb[22].mxu0 %vm185_vm0, %v1422_v30 }
 0xdcc   : > { %v2046_v33 = vpop.f32.mrb[20].mxu0 }
 0xdcd   : > { %v1511_v38 = vadd.f32 %v2046_v33, %v1426_v7  ;;  %v1505_v39 = vpop.f32.mrb[21].mxu0 }
 0xdce   : > { %v1506_v17 = vadd.f32 %v1505_v39, %v1426_v7 }
 0xdcf   : > { %v1525_v1 = vsub.f32 %v1511_v38, %v2210_v5 }
 0xdd0   : > { %v1524_v16 = vsub.f32 %v1506_v17, %v2211_v46  ;;  %v2049_v3 = vpop.f32.mrb[22].mxu0 }
 0xdd1   : > { %v1515_v48 = vpop.f32.mrb[23].mxu0  ;;  %v1529_v47 = vmul.f32 %v1525_v1, %v1525_v1  ;;  %v1521_v37 = vadd.f32 %v2049_v3, %v1426_v7  ;;  %v586_v1 = vcvt.s32.f32 %v2386_v13 }
 0xdd2   : > { %v1528_v40 = vmul.f32 %v1524_v16, %v1524_v16  ;;  %v1516_v35 = vadd.f32 %v1515_v48, %v1426_v7  ;;  %v895_v16 = vcvt.s32.f32 %v2436_v61  ;;  %v1204_v48 = vcvt.s32.f32 %v2492_v24 }
 0xdd3   : > { %v1535_v43 = vsel %vm185_vm0, %v1529_v47, 0.0  ;;  %v1527_v34 = vsub.f32 %v1521_v37, %v2212_v12 }
 0xdd4   : > { %1536 = vadd.xlane.f32.xlu1 %v1535_v43  ;;  %v1532_v20 = vsel %vm185_vm0, %v1528_v40, 0.0  ;;  %v1526_v36 = vsub.f32 %v1516_v35, %v2213_v10 }
 0xdd5   : > { %1533 = vadd.xlane.f32.xlu0 %v1532_v20  ;;  %v1531_v21 = vmul.f32 %v1527_v34, %v1527_v34 }
 0xdd6   : > { %v1530_v15 = vmul.f32 %v1526_v36, %v1526_v36 }
 0xdd7   : > { %v1541_v14 = vsel %vm185_vm0, %v1531_v21, 0.0 }
 0xdd8   : > { %v1538_v49 = vsel %vm185_vm0, %v1530_v15, 0.0  ;;  %vm1586_vm0 = vcmask 408576  }
 0xde5   : > { %1562 = vrot.lane.b32.xlu1 %v1511_v38, %s2258_s5 }
 0xde9   : > { %1564 = vrot.lane.b32.xlu1 %v1516_v35, %s2258_s5 }
 0xdeb   : > { %1560 = vrot.lane.b32.xlu0 %v1506_v17, %s2258_s5 }
 0xe0d   : > { %1542 = vadd.xlane.f32.xlu1 %v1541_v14 }
 0xe11   : > { %1539 = vadd.xlane.f32.xlu1 %v1538_v49 }
 0xe22   : > { %1566 = vrot.lane.b32.xlu1 %v1521_v37, %s2258_s5 }
 0xe61   : > { %v1537_v56 = vpop.xlane.xlu1 %1536 }
 0xe62   : > { %v1534_v57 = vpop.xlane.xlu0 %1533 }
 0xe65   : > { %v1563_v59 = vpop.permute.xlu1 %1562 }
 0xe66   : > { %v1573_v11 = vsel %vm413_vm1, %v2512_v32, %v1563_v59  ;;  %v1561_v18 = vpop.permute.xlu0 %1560  ;;  %v585_v32 = vcvt.s32.f32 %v2379_v9  ;;  %v1203_v9 = vcvt.s32.f32 %v2495_v25 }
 0xe67   : > { %v1578_v22 = vsel %vm1576_vm10, %v1573_v11, %v584_v58  ;;  %v1572_v63 = vsel %vm413_vm1, %v2518_v31, %v1561_v18 }
 0xe68   : > { %v1583_v52 = vsel %vm1581_vm11, %v1578_v22, %v893_v60  ;;  %v1577_v53 = vsel %vm1576_vm10, %v1572_v63, %v583_v44 }
 0xe69   : > { %v1582_v0 = vsel %vm1581_vm11, %v1577_v53, %v892_v6  ;;  %v1565_v26 = vpop.permute.xlu1 %1564  ;;  %v1588_v19 = vsel %vm1586_vm0, %v1583_v52, %v1202_v41 }
 0xe6a   : > { %v1574_v31 = vsel %vm413_vm1, %v2538_v29, %v1565_v26  ;;  %v1593_v45 = vsel %vm1591_vm12, %v1588_v19, %v1537_v56  ;;  %v1587_v2 = vsel %vm1586_vm0, %v1582_v0, %v1201_v8 }
 0xe6b   : > { %v1579_v62 = vsel %vm1576_vm10, %v1574_v31, %v585_v32  ;;  %v1592_v27 = vsel %vm1591_vm12, %v1587_v2, %v1534_v57  ;;  %v1598_v28 = vsel %vm1596_vm13, %v1593_v45, %v1549_v50 }
 0xe6c   : > { %v1584_v29 = vsel %vm1581_vm11, %v1579_v62, %v894_v23  ;;  %v1597_v30 = vsel %vm1596_vm13, %v1592_v27, %v1546_v51  ;;  %v1603_v33 = vsel %vm1601_vm14, %v1598_v28, 0.0 }
 0xe6d   : > { %v1589_v55 = vsel %vm1586_vm0, %v1584_v29, %v1203_v9  ;;  %v1602_v7 = vsel %vm1601_vm14, %v1597_v30, 0.0  ;;  %1607 = vst [vmem:[%s160_s8 + $0x8] sm:$0xff] %v1603_v33 }
 0xe6e   : > { %1606 = vst [vmem:[%s160_s8] sm:$0xff] %v1602_v7 }
 0xe9a   : > { %v1543_v38 = vpop.xlane.xlu1 %1542 }
 0xe9e   : > { %v1540_v25 = vpop.xlane.xlu1 %1539 }
 0xe9f   : > { %v1594_v39 = vsel %vm1591_vm12, %v1589_v55, %v1540_v25 }
 0xea0   : > { %v1599_v17 = vsel %vm1596_vm13, %v1594_v39, %v1552_v42 }
 0xea1   : > { %v1604_v5 = vsel %vm1601_vm14, %v1599_v17, 0.0 }
 0xea2   : > { %1608 = vst [vmem:[%s160_s8 + $0x10] sm:$0xff] %v1604_v5  ;;  %v1567_v46 = vpop.permute.xlu1 %1566 }
 0xea3   : > { %v1575_v3 = vsel %vm413_vm1, %v2530_v4, %v1567_v46 }
 0xea4   : > { %v1580_v47 = vsel %vm1576_vm10, %v1575_v3, %v586_v1 }
 0xea5   : > { %v1585_v40 = vsel %vm1581_vm11, %v1580_v47, %v895_v16 }
 0xea6   : > { %v1590_v43 = vsel %vm1586_vm0, %v1585_v40, %v1204_v48 }
 0xea7   : > { %v1595_v20 = vsel %vm1591_vm12, %v1590_v43, %v1543_v38 }
 0xea8   : > { %v1600_v35 = vsel %vm1596_vm13, %v1595_v20, %v1555_v54 }
 0xea9   : > { %v1605_v13 = vsel %vm1601_vm14, %v1600_v35, 0.0 }
 0xeaa   : > { %1609 = vst [vmem:[%s160_s8 + $0x18] sm:$0xff] %v1605_v13 }
 0xeab PF: > { %s13_s9 = sadd.s32 1, %s2252_s9  }
 0xeac   : > { %p10_p3 = scmp.ge.s32.totalorder %s13_s9, 4  }
 0xeae   :  { %12 = sbr.rel (!%p10_p3) target bundleno = 1 (0x1), region = 63 }
 0xeb5   :  { %1632 = vsyncpa [#allocation3], 1 }
 0xeb6   :  { %1634 = vsyncpa [#allocation3 + $0x1], 1 }

</bundles_post_ra>
